<compile_context>
chip_gen: v7x
topology: tpu7x:2x2x1
jax: 0.10.0
libtpu: 0.0.40
codegen_flags: <defaults>
</compile_context>

<pallas_src>
import jax
import jax.numpy as jnp
from jax import lax
from jax.experimental import pallas as pl
from jax.experimental.pallas import tpu as pltpu


def _round_up(x, m):
    return ((x + m - 1) // m) * m


def _distmult_kernel(q_ref, w_ref, out_ref):
    # q: (tile_b, D), w: (tile_e, D) native row-major layout.
    # Contract on the last dims => (tile_b, tile_e); f32 accumulation on the MXU.
    s = lax.dot_general(
        q_ref[...], w_ref[...],
        dimension_numbers=(((1,), (1,)), ((), ())),
        preferred_element_type=jnp.float32)
    out_ref[...] = jax.nn.sigmoid(s).astype(out_ref.dtype)


def prepare_entity_table(emb_e_w, *, weight_dtype=jnp.bfloat16, tile_e=2048):
    """Done ONCE at parameter-load time (NOT per forward call).

    Casts the (E, D) entity table to the streaming dtype and zero-pads the entity
    axis to a multiple of tile_e.  Native (E, D) layout is kept — no transpose.
    Returns (prepared_table, tile_e).
    """
    E, D = emb_e_w.shape
    tile_e = min(tile_e, _round_up(E, 128))
    E_pad = _round_up(E, tile_e)
    w = emb_e_w.astype(weight_dtype)
    if E_pad != E:
        w = jnp.pad(w, ((0, E_pad - E), (0, 0)))     # zero rows => sigmoid(0)=0.5, sliced off
    return w, tile_e


def distmult_forward(e1, rel, emb_e_w, emb_rel_w, emb_e_prepped, tile_e, *,
                     tile_b=1024, out_dtype=jnp.float32):
    """Pallas forward.  e1, rel: (B, 1) int32 indices; returns (B, num_entities) scores.

    emb_e_prepped / tile_e come from prepare_entity_table (hoisted to load time).
    """
    B = e1.shape[0]
    E, D = emb_e_w.shape
    E_pad = emb_e_prepped.shape[0]
    weight_dtype = emb_e_prepped.dtype

    # --- glue (plain JAX): tiny row gathers + per-example elementwise product.
    # Constant across the entity grid, so it lives in the wrapper, not the kernel.
    # Gather from the f32 master table; cast only the final q to the streaming dtype.
    e1f = e1.reshape(-1)
    relf = rel.reshape(-1)
    q = (emb_e_w[e1f] * emb_rel_w[relf]).astype(weight_dtype)          # (B, D)

    # --- batch tiling.  Pad to 16 rows so bf16 blocks fill whole sublane vregs.
    tile_b = min(tile_b, _round_up(B, 16))
    B_pad = _round_up(B, tile_b)
    if B_pad != B:
        q = jnp.pad(q, ((0, B_pad - B), (0, 0)))                       # zero rows, dropped

    # Grid: entity tiles OUTER, batch tiles INNER -> each weight tile's block index is
    # constant over the inner axis, so it is DMA'd from HBM exactly once.
    grid = (E_pad // tile_e, B_pad // tile_b)

    score = pl.pallas_call(
        _distmult_kernel,
        out_shape=jax.ShapeDtypeStruct((B_pad, E_pad), out_dtype),
        grid_spec=pltpu.PrefetchScalarGridSpec(
            num_scalar_prefetch=0,
            grid=grid,
            in_specs=[
                pl.BlockSpec((tile_b, D), lambda i, j: (j, 0)),        # q tile (batch axis)
                pl.BlockSpec((tile_e, D), lambda i, j: (i, 0)),        # weight tile, native layout
            ],
            out_specs=pl.BlockSpec((tile_b, tile_e), lambda i, j: (j, i)),
        ),
        compiler_params=pltpu.CompilerParams(
            dimension_semantics=("parallel", "parallel"),              # megacore shards entity tiles
            vmem_limit_bytes=32 * 1024 * 1024),                        # safe on v5e/v6e/v7x
    )(q, emb_e_prepped)

    return score[:B, :E]


def distmult_reference(e1, rel, emb_e_w, emb_rel_w):
    """Pure-JAX reference mirroring the PyTorch forward (eval mode: dropout = identity)."""
    e1f = e1.reshape(-1)
    relf = rel.reshape(-1)
    q = emb_e_w[e1f] * emb_rel_w[relf]
    return jax.nn.sigmoid(q @ emb_e_w.T)


if __name__ == "__main__":
    # Small shapes consistent with the module; E deliberately NOT a multiple of
    # 128/2048 to exercise the entity-axis padding path.
    B, E, R, D = 8, 2000, 16, 128

    key = jax.random.PRNGKey(0)
    k_e, k_r, k_e1, k_rel = jax.random.split(key, 4)

    emb_e_w = jax.random.normal(k_e, (E, D), jnp.float32) * 0.1
    emb_e_w = emb_e_w.at[0].set(0.0)          # padding_idx=0
    emb_rel_w = jax.random.normal(k_r, (R, D), jnp.float32) * 0.1
    emb_rel_w = emb_rel_w.at[0].set(0.0)      # padding_idx=0

    e1 = jax.random.randint(k_e1, (B, 1), 0, E, jnp.int32)
    rel = jax.random.randint(k_rel, (B, 1), 0, R, jnp.int32)

    ref = distmult_reference(e1, rel, emb_e_w, emb_rel_w)

    # f32 weight stream (exactness check).  Table prep hoisted to "load time".
    w_f32, te_f32 = prepare_entity_table(emb_e_w, weight_dtype=jnp.float32)
    out = distmult_forward(e1, rel, emb_e_w, emb_rel_w, w_f32, te_f32)
    out = jax.block_until_ready(out)
    assert out.shape == (B, E)
    assert jnp.allclose(out, ref, atol=2e-4, rtol=2e-4), "f32 kernel mismatch vs. reference"

    # bf16 weight stream (the memory-bound default / fast path), f32 MXU accumulation.
    w_bf16, te_bf16 = prepare_entity_table(emb_e_w)                    # bf16 default
    out_bf16 = distmult_forward(e1, rel, emb_e_w, emb_rel_w, w_bf16, te_bf16)
    out_bf16 = jax.block_until_ready(out_bf16)
    assert out_bf16.shape == (B, E)
    assert jnp.allclose(out_bf16, ref, atol=2e-2, rtol=2e-2), "bf16 kernel mismatch vs. reference"

    print("KERNEL_OK")
</pallas_src>

<mosaic_0001>
module attributes {stable_mosaic.version = 11 : i64} {
  func.func @_distmult_kernel(%arg0: i32, %arg1: i32, %arg2: memref<16x128xf32, #tpu.memory_space<vmem>>, %arg3: memref<2048x128xf32, #tpu.memory_space<vmem>>, %arg4: memref<16x2048xf32, #tpu.memory_space<vmem>>) attributes {dimension_semantics = [#tpu.dimension_semantics<parallel>, #tpu.dimension_semantics<parallel>], iteration_bounds = array<i64: 1, 1>, scalar_prefetch = 0 : i64, scratch_operands = 0 : i64, tpu.core_type = #tpu.core_type<tc>, window_params = [{transform_indices = @transform_0, window_bounds = array<i64: 16, 128>}, {transform_indices = @transform_1, window_bounds = array<i64: 2048, 128>}, {transform_indices = @transform_2, window_bounds = array<i64: 16, 2048>}]} {
    %c0 = arith.constant 0 : index
    %c0_0 = arith.constant 0 : index
    %0 = vector.load %arg2[%c0, %c0_0] : memref<16x128xf32, #tpu.memory_space<vmem>>, vector<16x128xf32>
    %c0_1 = arith.constant 0 : index
    %c0_2 = arith.constant 0 : index
    %1 = vector.load %arg3[%c0_1, %c0_2] : memref<2048x128xf32, #tpu.memory_space<vmem>>, vector<2048x128xf32>
    %cst = arith.constant dense<0.000000e+00> : vector<16x2048xf32>
    %2 = tpu.matmul %0, %1, %cst {dimension_numbers = #tpu.dot_dimension_numbers<[1], [1], [0], [0], [0, 0, 1, 0], [], []>} : vector<16x128xf32>, vector<2048x128xf32>, vector<16x2048xf32> -> vector<16x2048xf32>
    %3 = arith.negf %2 : vector<16x2048xf32>
    %4 = math.exp %3 : vector<16x2048xf32>
    %cst_3 = arith.constant 1.000000e+00 : f32
    %5 = vector.broadcast %cst_3 : f32 to vector<16x2048xf32>
    %6 = arith.addf %5, %4 : vector<16x2048xf32>
    %7 = arith.divf %5, %6 : vector<16x2048xf32>
    %c0_4 = arith.constant 0 : index
    %c0_5 = arith.constant 0 : index
    %8 = vector.load %arg4[%c0_4, %c0_5] : memref<16x2048xf32, #tpu.memory_space<vmem>>, vector<16x2048xf32>
    tpu.vector_store %arg4[%c0_4, %c0_5], %7 {strides = array<i32>} : memref<16x2048xf32, #tpu.memory_space<vmem>>, vector<16x2048xf32>,
    return
  }
  func.func @transform_0(%arg0: i32, %arg1: i32) -> (i32, i32) {
    %c0_i32 = arith.constant 0 : i32
    %c0_i32_0 = arith.constant 0 : i32
    return %arg1, %c0_i32 : i32, i32
  }
  func.func @transform_1(%arg0: i32, %arg1: i32) -> (i32, i32) {
    %c0_i32 = arith.constant 0 : i32
    %c0_i32_0 = arith.constant 0 : i32
    return %arg0, %c0_i32 : i32, i32
  }
  func.func @transform_2(%arg0: i32, %arg1: i32) -> (i32, i32) {
    %c0_i32 = arith.constant 0 : i32
    return %arg1, %arg0 : i32, i32
  }
}

</mosaic_0001>

<bundles_post_ra>
// kernel: tpu_custom_call.1
= control target key start
LH: loop header
LB: loop body
LE: loop exit
PB: predicated region body
PF: predicated region fallthrough
CT: control target
= control target key end

     0   :  { %7 = vsyncpa [#allocation3], 0  ;;  %s2036_s0 = inlined_call_operand.hbm [shape: f32[16,128], index: 0, kind: input, shape index: {}]   ;;  %s2037_s1 = inlined_call_operand.hbm [shape: f32[2048,128], index: 1, kind: input, shape index: {}]   ;;  %s2038_s2 = inlined_call_operand.hbm [shape: f32[16,2048], index: 2, kind: output, shape index: {}]  }
   0x1   :  { %8 = vsyncpa [#allocation6], 0 }
   0x2   :  { %9 = vsyncpa [#allocation4], 0  ;;  %s1938_s9 = smov [#allocation2]   ;;  %s1866_s13 = scalar_lea.hbm %s2036_s0, 256 }
   0x3   :  { %s15_s10 = sshll.u32 %s1938_s9, 4  ;;  %p1867_p0 = scmp.ne.s32.totalorder %s2036_s0, %s1866_s13  ;;  %s16_s10 = int_to_ptr.vmem [resolvable:$true] %s15_s10 }
   0x4   :  { %p1870_p1 = scmp.lt.u32.totalorder %s1866_s13, %s2036_s0 }
   0x6   :  { %p1872_p2 = pnand %p1870_p1, %p1867_p0 }
   0x8   :  { %1875 = shalt.err (!%p1872_p2)
}
   0x9   :  { %s1876_s18 = scalar_lea.vmem %s16_s10, 256  ;;  %p1881_p4 = scmp.lt.s32.totalorder %s16_s10, %s16_s10 }
   0xa   :  { %p1877_p3 = scmp.ne.s32.totalorder %s16_s10, %s1876_s18  ;;  %p1882_p5 = scmp.lt.s32.totalorder %s1876_s18, %s1876_s18 }
   0xc   :  { %p1883_p6 = por %p1882_p5, %p1881_p4 }
   0xe   :  { %p1884_p7 = pnand %p1883_p6, %p1877_p3 }
  0x10   :  { %1887 = shalt.err (!%p1884_p7)
}
  0x11   :  { %s1939_s19 = smov 128   ;;  %s1940_s20 = smov 8  }
  0x12   :  { %21 = dma.hbm_to_vmem [thread:$0]  %s2036_s0, 256, %s16_s10, [#allocation3], %s1939_s19, %s1939_s19, %s1940_s20  }
  0x13   :  { %s1941_s23 = smov [#allocation5]   ;;  %s1888_s27 = scalar_lea.hbm %s2037_s1, 32768 }
  0x14   :  { %s27_s24 = sshll.u32 %s1941_s23, 4  ;;  %p1889_p8 = scmp.ne.s32.totalorder %s2037_s1, %s1888_s27  ;;  %s28_s24 = int_to_ptr.vmem [resolvable:$true] %s27_s24 }
  0x15   :  { %p1892_p9 = scmp.lt.u32.totalorder %s1888_s27, %s2037_s1 }
  0x17   :  { %p1894_p10 = pnand %p1892_p9, %p1889_p8 }
  0x19   :  { %1897 = shalt.err (!%p1894_p10)
}
  0x1a   :  { %s1898_s4 = scalar_lea.vmem %s28_s24, 32768  ;;  %p1903_p12 = scmp.lt.s32.totalorder %s28_s24, %s28_s24 }
  0x1b   :  { %p1899_p11 = scmp.ne.s32.totalorder %s28_s24, %s1898_s4  ;;  %p1904_p13 = scmp.lt.s32.totalorder %s1898_s4, %s1898_s4 }
  0x1d   :  { %p1905_p0 = por %p1904_p13, %p1903_p12 }
  0x1f   :  { %p1906_p1 = pnand %p1905_p0, %p1899_p11 }
  0x21   :  { %1909 = shalt.err (!%p1906_p1)
}
  0x22   :  { %33 = dma.hbm_to_vmem [thread:$0]  %s2037_s1, 32768, %s28_s24, [#allocation6], %s1939_s19, %s1939_s19, %s1940_s20  }
  0x23   :  { %1932 = dma.done.wait [#allocation3], 256  }
  0x24   :  { %1933 = vsyncadd [#allocation3], 4294967040 }
  0x25   :  { %1934 = dma.done.wait [#allocation6], 32768  }
  0x26   :  { %1935 = vsyncadd [#allocation6], 4294934528  ;;  %v58_v0 = vld [vmem:[#allocation5 + $0x80] sm:$0xff]  ;;  %v59_v1 = vld [vmem:[#allocation5 + $0x88] sm:$0xff]  ;;  %s1942_s1 = smov [#allocation7]  }
  0x27   :  { %v90_v2 = vld [vmem:[#allocation5 + $0x180] sm:$0xff]  ;;  %v1476_v3 = vpack.c.bf16 %v59_v1, %v58_v0  ;;  %v91_v4 = vld [vmem:[#allocation5 + $0x188] sm:$0xff]  ;;  %v60_v11 = vld [vmem:[#allocation5 + $0x90] sm:$0xff]  ;;  %s1143_s6 = sshll.u32 %s1942_s1, 4  ;;  %s1144_s6 = int_to_ptr.vmem [resolvable:$true] %s1143_s6 }
  0x28   :  { %v42_v5 = vld [vmem:[#allocation5] sm:$0xff]  ;;  %v43_v6 = vld [vmem:[#allocation5 + $0x8] sm:$0xff]  ;;  %v1508_v7 = vpack.c.bf16 %v91_v4, %v90_v2  ;;  %v61_v13 = vld [vmem:[#allocation5 + $0x98] sm:$0xff]  ;;  %s1910_s7 = scalar_lea.vmem %s1144_s6, 4096  ;;  %p1915_p3 = scmp.lt.s32.totalorder %s1144_s6, %s1144_s6 }
  0x29   :  { %v1478_v8 = vpack.c.bf16 %v43_v6, %v42_v5  ;;  %v74_v9 = vld [vmem:[#allocation5 + $0x100] sm:$0xff]  ;;  %v75_v10 = vld [vmem:[#allocation5 + $0x108] sm:$0xff]  ;;  %1477 = vmatprep.subr.bf16.mxu0 %v1476_v3  ;;  %v92_v14 = vld [vmem:[#allocation5 + $0x190] sm:$0xff]  ;;  %v1480_v16 = vpack.c.bf16 %v61_v13, %v60_v11  ;;  %p1911_p2 = scmp.ne.s32.totalorder %s1144_s6, %s1910_s7  ;;  %p1916_p4 = scmp.lt.s32.totalorder %s1910_s7, %s1910_s7 }
  0x2a   :  { %v1510_v12 = vpack.c.bf16 %v75_v10, %v74_v9  ;;  %v93_v15 = vld [vmem:[#allocation5 + $0x198] sm:$0xff]  ;;  %1509 = vmatprep.subr.bf16.mxu1 %v1508_v7  ;;  %v44_v18 = vld [vmem:[#allocation5 + $0x10] sm:$0xff]  ;;  %v62_v22 = vld [vmem:[#allocation5 + $0xa0] sm:$0xff] }
  0x2b   :  { %1479 = vmatpush3.bf16.xpose.msra.mxu0 %v1478_v8  ;;  %v1512_v17 = vpack.c.bf16 %v93_v15, %v92_v14  ;;  %v45_v19 = vld [vmem:[#allocation5 + $0x18] sm:$0xff]  ;;  %v76_v20 = vld [vmem:[#allocation5 + $0x110] sm:$0xff]  ;;  %v63_v23 = vld [vmem:[#allocation5 + $0xa8] sm:$0xff]  ;;  %p1917_p5 = por %p1916_p4, %p1915_p3 }
  0x2c   :  { %1511 = vmatpush3.bf16.xpose.msra.mxu1 %v1510_v12  ;;  %1481 = vmatprep.subr.bf16.mxu0 %v1480_v16  ;;  %v77_v21 = vld [vmem:[#allocation5 + $0x118] sm:$0xff]  ;;  %v94_v24 = vld [vmem:[#allocation5 + $0x1a0] sm:$0xff]  ;;  %v95_v25 = vld [vmem:[#allocation5 + $0x1a8] sm:$0xff]  ;;  %v1482_v26 = vpack.c.bf16 %v45_v19, %v44_v18  ;;  %v1484_v28 = vpack.c.bf16 %v63_v23, %v62_v22 }
  0x2d   :  { %1513 = vmatprep.subr.bf16.mxu1 %v1512_v17  ;;  %v1514_v27 = vpack.c.bf16 %v77_v21, %v76_v20  ;;  %v1516_v29 = vpack.c.bf16 %v95_v25, %v94_v24  ;;  %v46_v30 = vld [vmem:[#allocation5 + $0x20] sm:$0xff]  ;;  %v47_v31 = vld [vmem:[#allocation5 + $0x28] sm:$0xff]  ;;  %v64_v34 = vld [vmem:[#allocation5 + $0xb0] sm:$0xff]  ;;  %p1918_p6 = pnand %p1917_p5, %p1911_p2 }
  0x2e   :  { %v78_v32 = vld [vmem:[#allocation5 + $0x120] sm:$0xff]  ;;  %v79_v33 = vld [vmem:[#allocation5 + $0x128] sm:$0xff]  ;;  %v65_v35 = vld [vmem:[#allocation5 + $0xb8] sm:$0xff]  ;;  %v1486_v38 = vpack.c.bf16 %v47_v31, %v46_v30 }
  0x2f   :  { %v96_v36 = vld [vmem:[#allocation5 + $0x1b0] sm:$0xff]  ;;  %v97_v37 = vld [vmem:[#allocation5 + $0x1b8] sm:$0xff]  ;;  %v1518_v39 = vpack.c.bf16 %v79_v33, %v78_v32  ;;  %v1488_v40 = vpack.c.bf16 %v65_v35, %v64_v34  ;;  %v66_v47 = vld [vmem:[#allocation5 + $0xc0] sm:$0xff] }
  0x30   :  { %v1520_v41 = vpack.c.bf16 %v97_v37, %v96_v36  ;;  %v48_v42 = vld [vmem:[#allocation5 + $0x30] sm:$0xff]  ;;  %v49_v43 = vld [vmem:[#allocation5 + $0x38] sm:$0xff]  ;;  %v67_v48 = vld [vmem:[#allocation5 + $0xc8] sm:$0xff] }
  0x31   :  { %v80_v44 = vld [vmem:[#allocation5 + $0x130] sm:$0xff]  ;;  %v81_v46 = vld [vmem:[#allocation5 + $0x138] sm:$0xff]  ;;  %v98_v49 = vld [vmem:[#allocation5 + $0x1c0] sm:$0xff]  ;;  %v1490_v51 = vpack.c.bf16 %v49_v43, %v48_v42  ;;  %v1492_v53 = vpack.c.bf16 %v67_v48, %v66_v47 }
  0x32   :  { %v1987_v45 = vld [vmem:[#allocation2] sm:$0xff]  ;;  %v99_v50 = vld [vmem:[#allocation5 + $0x1c8] sm:$0xff]  ;;  %v1522_v52 = vpack.c.bf16 %v81_v46, %v80_v44  ;;  %v50_v55 = vld [vmem:[#allocation5 + $0x40] sm:$0xff] }
  0x33   :  { %1483 = vmatpush3.bf16.xpose.msra.mxu0 %v1482_v26  ;;  %1220 = vmatprep.mubr.f32.mxu0 %v1987_v45  ;;  %v1524_v54 = vpack.c.bf16 %v99_v50, %v98_v49  ;;  %v51_v56 = vld [vmem:[#allocation5 + $0x48] sm:$0xff]  ;;  %v82_v57 = vld [vmem:[#allocation5 + $0x140] sm:$0xff]  ;;  %v68_v59 = vld [vmem:[#allocation5 + $0xd0] sm:$0xff] }
  0x34   :  { %1515 = vmatpush3.bf16.xpose.msra.mxu1 %v1514_v27  ;;  %1485 = vmatprep.subr.bf16.mxu0 %v1484_v28  ;;  %v83_v58 = vld [vmem:[#allocation5 + $0x148] sm:$0xff]  ;;  %v69_v60 = vld [vmem:[#allocation5 + $0xd8] sm:$0xff]  ;;  %v100_v61 = vld [vmem:[#allocation5 + $0x1d0] sm:$0xff]  ;;  %v1494_v63 = vpack.c.bf16 %v51_v56, %v50_v55 }
  0x35   :  { %1517 = vmatprep.subr.bf16.mxu1 %v1516_v29  ;;  %1256 = vmatprep.mubr.f32.mxu1 %v1987_v45  ;;  %v101_v62 = vld [vmem:[#allocation5 + $0x1d8] sm:$0xff]  ;;  %v1526_v0 = vpack.c.bf16 %v83_v58, %v82_v57  ;;  %v1496_v1 = vpack.c.bf16 %v69_v60, %v68_v59  ;;  %v52_v3 = vld [vmem:[#allocation5 + $0x50] sm:$0xff]  ;;  %v70_v7 = vld [vmem:[#allocation5 + $0xe0] sm:$0xff] }
  0x36   :  { %v1528_v2 = vpack.c.bf16 %v101_v62, %v100_v61  ;;  %v53_v4 = vld [vmem:[#allocation5 + $0x58] sm:$0xff]  ;;  %v84_v5 = vld [vmem:[#allocation5 + $0x150] sm:$0xff]  ;;  %v71_v8 = vld [vmem:[#allocation5 + $0xe8] sm:$0xff] }
  0x37   :  { %v85_v6 = vld [vmem:[#allocation5 + $0x158] sm:$0xff]  ;;  %v102_v9 = vld [vmem:[#allocation5 + $0x1e0] sm:$0xff]  ;;  %v103_v10 = vld [vmem:[#allocation5 + $0x1e8] sm:$0xff]  ;;  %v1498_v11 = vpack.c.bf16 %v53_v4, %v52_v3  ;;  %v1500_v13 = vpack.c.bf16 %v71_v8, %v70_v7 }
  0x38   :  { %v1530_v12 = vpack.c.bf16 %v85_v6, %v84_v5  ;;  %v1532_v14 = vpack.c.bf16 %v103_v10, %v102_v9  ;;  %v54_v15 = vld [vmem:[#allocation5 + $0x60] sm:$0xff]  ;;  %v55_v16 = vld [vmem:[#allocation5 + $0x68] sm:$0xff]  ;;  %v72_v19 = vld [vmem:[#allocation5 + $0xf0] sm:$0xff] }
  0x39   :  { %v86_v17 = vld [vmem:[#allocation5 + $0x160] sm:$0xff]  ;;  %v87_v18 = vld [vmem:[#allocation5 + $0x168] sm:$0xff]  ;;  %v73_v20 = vld [vmem:[#allocation5 + $0xf8] sm:$0xff]  ;;  %v1502_v23 = vpack.c.bf16 %v55_v16, %v54_v15 }
  0x3a   :  { %v104_v21 = vld [vmem:[#allocation5 + $0x1f0] sm:$0xff]  ;;  %v105_v22 = vld [vmem:[#allocation5 + $0x1f8] sm:$0xff]  ;;  %v1534_v24 = vpack.c.bf16 %v87_v18, %v86_v17  ;;  %v1504_v25 = vpack.c.bf16 %v73_v20, %v72_v19  ;;  %v122_v31 = vld [vmem:[#allocation5 + $0x280] sm:$0xff] }
  0x3b   :  { %1487 = vmatpush3.bf16.xpose.msra.mxu0 %v1486_v38  ;;  %v1536_v26 = vpack.c.bf16 %v105_v22, %v104_v21  ;;  %v56_v27 = vld [vmem:[#allocation5 + $0x70] sm:$0xff]  ;;  %v57_v28 = vld [vmem:[#allocation5 + $0x78] sm:$0xff]  ;;  %v123_v32 = vld [vmem:[#allocation5 + $0x288] sm:$0xff] }
  0x3c   :  { %1519 = vmatpush3.bf16.xpose.msra.mxu1 %v1518_v39  ;;  %1489 = vmatprep.subr.bf16.mxu0 %v1488_v40  ;;  %v88_v29 = vld [vmem:[#allocation5 + $0x170] sm:$0xff]  ;;  %v89_v30 = vld [vmem:[#allocation5 + $0x178] sm:$0xff]  ;;  %v154_v33 = vld [vmem:[#allocation5 + $0x380] sm:$0xff]  ;;  %v1506_v35 = vpack.c.bf16 %v57_v28, %v56_v27  ;;  %v1540_v37 = vpack.c.bf16 %v123_v32, %v122_v31 }
  0x3d   :  { %1521 = vmatprep.subr.bf16.mxu1 %v1520_v41  ;;  %v155_v34 = vld [vmem:[#allocation5 + $0x388] sm:$0xff]  ;;  %v1538_v36 = vpack.c.bf16 %v89_v30, %v88_v29  ;;  %v106_v39 = vld [vmem:[#allocation5 + $0x200] sm:$0xff]  ;;  %v124_v43 = vld [vmem:[#allocation5 + $0x290] sm:$0xff] }
  0x3e   :  { %v1572_v38 = vpack.c.bf16 %v155_v34, %v154_v33  ;;  %v107_v40 = vld [vmem:[#allocation5 + $0x208] sm:$0xff]  ;;  %v138_v41 = vld [vmem:[#allocation5 + $0x300] sm:$0xff]  ;;  %v125_v44 = vld [vmem:[#allocation5 + $0x298] sm:$0xff] }
  0x3f   :  { %v139_v42 = vld [vmem:[#allocation5 + $0x308] sm:$0xff]  ;;  %v156_v46 = vld [vmem:[#allocation5 + $0x390] sm:$0xff]  ;;  %v157_v47 = vld [vmem:[#allocation5 + $0x398] sm:$0xff]  ;;  %v1542_v48 = vpack.c.bf16 %v107_v40, %v106_v39  ;;  %v1544_v50 = vpack.c.bf16 %v125_v44, %v124_v43 }
  0x40   :  { %v1574_v49 = vpack.c.bf16 %v139_v42, %v138_v41  ;;  %v140_v55 = vld [vmem:[#allocation5 + $0x310] sm:$0xff]  ;;  %v141_v56 = vld [vmem:[#allocation5 + $0x318] sm:$0xff]  ;;  %v126_v57 = vld [vmem:[#allocation5 + $0x2a0] sm:$0xff] }
  0x41   :  { %v127_v58 = vld [vmem:[#allocation5 + $0x2a8] sm:$0xff]  ;;  %v158_v59 = vld [vmem:[#allocation5 + $0x3a0] sm:$0xff]  ;;  %v1578_v62 = vpack.c.bf16 %v141_v56, %v140_v55  ;;  %v128_v5 = vld [vmem:[#allocation5 + $0x2b0] sm:$0xff] }
  0x42   :  { %v159_v60 = vld [vmem:[#allocation5 + $0x3a8] sm:$0xff]  ;;  %v142_v3 = vld [vmem:[#allocation5 + $0x320] sm:$0xff]  ;;  %v129_v6 = vld [vmem:[#allocation5 + $0x2b8] sm:$0xff] }
  0x43   :  { %1491 = vmatpush3.bf16.xpose.msra.mxu0 %v1490_v51  ;;  %v1576_v51 = vpack.c.bf16 %v157_v47, %v156_v46  ;;  %v143_v4 = vld [vmem:[#allocation5 + $0x328] sm:$0xff]  ;;  %v160_v7 = vld [vmem:[#allocation5 + $0x3b0] sm:$0xff]  ;;  %v161_v8 = vld [vmem:[#allocation5 + $0x3b8] sm:$0xff] }
  0x44   :  { %1523 = vmatpush3.bf16.xpose.msra.mxu1 %v1522_v52  ;;  %1493 = vmatprep.subr.bf16.mxu0 %v1492_v53  ;;  %v1992_v52 = vld [vmem:[#allocation2 + $0x8] sm:$0xff]  ;;  %v108_v53 = vld [vmem:[#allocation5 + $0x210] sm:$0xff]  ;;  %v1582_v10 = vpack.c.bf16 %v143_v4, %v142_v3  ;;  %v130_v17 = vld [vmem:[#allocation5 + $0x2c0] sm:$0xff] }
  0x45   :  { %1525 = vmatprep.subr.bf16.mxu1 %v1524_v54  ;;  %v109_v54 = vld [vmem:[#allocation5 + $0x218] sm:$0xff]  ;;  %v144_v15 = vld [vmem:[#allocation5 + $0x330] sm:$0xff]  ;;  %v131_v18 = vld [vmem:[#allocation5 + $0x2c8] sm:$0xff] }
  0x46   :  { %v1546_v61 = vpack.c.bf16 %v109_v54, %v108_v53  ;;  %v145_v16 = vld [vmem:[#allocation5 + $0x338] sm:$0xff]  ;;  %v162_v19 = vld [vmem:[#allocation5 + $0x3c0] sm:$0xff]  ;;  %v163_v20 = vld [vmem:[#allocation5 + $0x3c8] sm:$0xff] }
  0x47   :  { %v1586_v22 = vpack.c.bf16 %v145_v16, %v144_v15  ;;  %v146_v27 = vld [vmem:[#allocation5 + $0x340] sm:$0xff]  ;;  %v147_v28 = vld [vmem:[#allocation5 + $0x348] sm:$0xff]  ;;  %v132_v29 = vld [vmem:[#allocation5 + $0x2d0] sm:$0xff] }
  0x48   :  { %v133_v30 = vld [vmem:[#allocation5 + $0x2d8] sm:$0xff]  ;;  %v164_v31 = vld [vmem:[#allocation5 + $0x3d0] sm:$0xff]  ;;  %v1590_v34 = vpack.c.bf16 %v147_v28, %v146_v27  ;;  %v134_v41 = vld [vmem:[#allocation5 + $0x2e0] sm:$0xff] }
  0x49   :  { %v165_v32 = vld [vmem:[#allocation5 + $0x3d8] sm:$0xff]  ;;  %v148_v39 = vld [vmem:[#allocation5 + $0x350] sm:$0xff]  ;;  %v135_v42 = vld [vmem:[#allocation5 + $0x2e8] sm:$0xff] }
  0x4a   :  { %v149_v40 = vld [vmem:[#allocation5 + $0x358] sm:$0xff]  ;;  %v166_v43 = vld [vmem:[#allocation5 + $0x3e0] sm:$0xff]  ;;  %v167_v44 = vld [vmem:[#allocation5 + $0x3e8] sm:$0xff] }
  0x4b   :  { %1495 = vmatpush3.bf16.xpose.msra.mxu0 %v1494_v63  ;;  %v1548_v63 = vpack.c.bf16 %v127_v58, %v126_v57  ;;  %v1594_v47 = vpack.c.bf16 %v149_v40, %v148_v39  ;;  %v150_v53 = vld [vmem:[#allocation5 + $0x360] sm:$0xff]  ;;  %v151_v54 = vld [vmem:[#allocation5 + $0x368] sm:$0xff]  ;;  %v136_v55 = vld [vmem:[#allocation5 + $0x2f0] sm:$0xff] }
  0x4c   :  { %1527 = vmatpush3.bf16.xpose.msra.mxu1 %v1526_v0  ;;  %1497 = vmatprep.subr.bf16.mxu0 %v1496_v1  ;;  %v1580_v0 = vpack.c.bf16 %v159_v60, %v158_v59  ;;  %v110_v1 = vld [vmem:[#allocation5 + $0x220] sm:$0xff]  ;;  %v137_v56 = vld [vmem:[#allocation5 + $0x2f8] sm:$0xff]  ;;  %v168_v57 = vld [vmem:[#allocation5 + $0x3f0] sm:$0xff]  ;;  %v1598_v60 = vpack.c.bf16 %v151_v54, %v150_v53 }
  0x4d   :  { %1529 = vmatprep.subr.bf16.mxu1 %v1528_v2  ;;  %v111_v2 = vld [vmem:[#allocation5 + $0x228] sm:$0xff]  ;;  %v169_v58 = vld [vmem:[#allocation5 + $0x3f8] sm:$0xff]  ;;  %v186_v3 = vld [vmem:[#allocation5 + $0x480] sm:$0xff] }
  0x4e   :  { %v1550_v9 = vpack.c.bf16 %v111_v2, %v110_v1  ;;  %v152_v1 = vld [vmem:[#allocation5 + $0x370] sm:$0xff]  ;;  %v153_v2 = vld [vmem:[#allocation5 + $0x378] sm:$0xff]  ;;  %v187_v4 = vld [vmem:[#allocation5 + $0x488] sm:$0xff] }
  0x4f   :  { %v188_v15 = vld [vmem:[#allocation5 + $0x490] sm:$0xff]  ;;  %v189_v16 = vld [vmem:[#allocation5 + $0x498] sm:$0xff]  ;;  %v190_v27 = vld [vmem:[#allocation5 + $0x4a0] sm:$0xff] }
  0x50   :  { %v191_v28 = vld [vmem:[#allocation5 + $0x4a8] sm:$0xff]  ;;  %v192_v39 = vld [vmem:[#allocation5 + $0x4b0] sm:$0xff]  ;;  %v193_v40 = vld [vmem:[#allocation5 + $0x4b8] sm:$0xff] }
  0x51   :  { %v194_v53 = vld [vmem:[#allocation5 + $0x4c0] sm:$0xff]  ;;  %v195_v54 = vld [vmem:[#allocation5 + $0x4c8] sm:$0xff] }
  0x53   :  { %1499 = vmatpush3.bf16.xpose.msra.mxu0 %v1498_v11  ;;  %v1552_v11 = vpack.c.bf16 %v129_v6, %v128_v5  ;;  %v218_v5 = vld [vmem:[#allocation5 + $0x580] sm:$0xff]  ;;  %v219_v6 = vld [vmem:[#allocation5 + $0x588] sm:$0xff] }
  0x54   :  { %1531 = vmatpush3.bf16.xpose.msra.mxu1 %v1530_v12  ;;  %1501 = vmatprep.subr.bf16.mxu0 %v1500_v13  ;;  %v1584_v12 = vpack.c.bf16 %v161_v8, %v160_v7  ;;  %v112_v13 = vld [vmem:[#allocation5 + $0x230] sm:$0xff]  ;;  %v1602_v8 = vpack.c.bf16 %v153_v2, %v152_v1  ;;  %v197_v2 = vld [vmem:[#allocation5 + $0x4d8] sm:$0xff] }
  0x55   :  { %1533 = vmatprep.subr.bf16.mxu1 %v1532_v14  ;;  %v113_v14 = vld [vmem:[#allocation5 + $0x238] sm:$0xff]  ;;  %v196_v1 = vld [vmem:[#allocation5 + $0x4d0] sm:$0xff] }
  0x56   :  { %v1554_v21 = vpack.c.bf16 %v113_v14, %v112_v13  ;;  %v202_v13 = vld [vmem:[#allocation5 + $0x500] sm:$0xff]  ;;  %v203_v14 = vld [vmem:[#allocation5 + $0x508] sm:$0xff] }
  0x5b   :  { %1503 = vmatpush3.bf16.xpose.msra.mxu0 %v1502_v23  ;;  %v1556_v23 = vpack.c.bf16 %v131_v18, %v130_v17  ;;  %v220_v17 = vld [vmem:[#allocation5 + $0x590] sm:$0xff]  ;;  %v221_v18 = vld [vmem:[#allocation5 + $0x598] sm:$0xff] }
  0x5c   :  { %1535 = vmatpush3.bf16.xpose.msra.mxu1 %v1534_v24  ;;  %1505 = vmatprep.subr.bf16.mxu0 %v1504_v25  ;;  %v1588_v24 = vpack.c.bf16 %v163_v20, %v162_v19  ;;  %v114_v25 = vld [vmem:[#allocation5 + $0x240] sm:$0xff]  ;;  %v1638_v20 = vpack.c.bf16 %v203_v14, %v202_v13  ;;  %v199_v14 = vld [vmem:[#allocation5 + $0x4e8] sm:$0xff] }
  0x5d   :  { %1537 = vmatprep.subr.bf16.mxu1 %v1536_v26  ;;  %v115_v26 = vld [vmem:[#allocation5 + $0x248] sm:$0xff]  ;;  %v198_v13 = vld [vmem:[#allocation5 + $0x4e0] sm:$0xff] }
  0x5e   :  { %v1558_v33 = vpack.c.bf16 %v115_v26, %v114_v25  ;;  %v204_v25 = vld [vmem:[#allocation5 + $0x510] sm:$0xff]  ;;  %v205_v26 = vld [vmem:[#allocation5 + $0x518] sm:$0xff] }
  0x63   :  { %1507 = vmatpush3.bf16.xpose.msra.mxu0 %v1506_v35  ;;  %v1560_v35 = vpack.c.bf16 %v133_v30, %v132_v29  ;;  %v222_v29 = vld [vmem:[#allocation5 + $0x5a0] sm:$0xff]  ;;  %v223_v30 = vld [vmem:[#allocation5 + $0x5a8] sm:$0xff] }
  0x64   :  { %1539 = vmatpush3.bf16.xpose.msra.mxu1 %v1538_v36  ;;  %1541 = vmatprep.subr.bf16.mxu0 %v1540_v37  ;;  %v1592_v36 = vpack.c.bf16 %v165_v32, %v164_v31  ;;  %v116_v37 = vld [vmem:[#allocation5 + $0x250] sm:$0xff]  ;;  %v1642_v32 = vpack.c.bf16 %v205_v26, %v204_v25  ;;  %v201_v26 = vld [vmem:[#allocation5 + $0x4f8] sm:$0xff] }
  0x65   :  { %1573 = vmatprep.subr.bf16.mxu1 %v1572_v38  ;;  %v117_v38 = vld [vmem:[#allocation5 + $0x258] sm:$0xff]  ;;  %v200_v25 = vld [vmem:[#allocation5 + $0x4f0] sm:$0xff] }
  0x66   :  { %v1562_v46 = vpack.c.bf16 %v117_v38, %v116_v37  ;;  %v206_v37 = vld [vmem:[#allocation5 + $0x520] sm:$0xff]  ;;  %v207_v38 = vld [vmem:[#allocation5 + $0x528] sm:$0xff] }
  0x6a   :  { %1221 = vmatmul.mubr.f32.vlgmr.msra.gmra.mrb[0].mxu0 %v1987_v45 }
  0x6b   :  { %1257 = vmatmul.mubr.f32.vlgmr.msra.gmra.mrb[0].mxu1 %v1987_v45  ;;  %1543 = vmatpush3.bf16.xpose.msra.mxu0 %v1542_v48  ;;  %v1564_v48 = vpack.c.bf16 %v135_v42, %v134_v41  ;;  %v224_v41 = vld [vmem:[#allocation5 + $0x5b0] sm:$0xff]  ;;  %v225_v42 = vld [vmem:[#allocation5 + $0x5b8] sm:$0xff] }
  0x6c   :  { %1575 = vmatpush3.bf16.xpose.msra.mxu1 %v1574_v49  ;;  %1545 = vmatprep.subr.bf16.mxu0 %v1544_v50  ;;  %v1596_v49 = vpack.c.bf16 %v167_v44, %v166_v43  ;;  %v118_v50 = vld [vmem:[#allocation5 + $0x260] sm:$0xff]  ;;  %v1646_v44 = vpack.c.bf16 %v207_v38, %v206_v37  ;;  %v251_v38 = vld [vmem:[#allocation5 + $0x688] sm:$0xff] }
  0x6d   :  { %1577 = vmatprep.subr.bf16.mxu1 %v1576_v51  ;;  %1222 = vmatprep.mubr.f32.mxu0 %v1992_v52  ;;  %v119_v51 = vld [vmem:[#allocation5 + $0x268] sm:$0xff]  ;;  %v250_v37 = vld [vmem:[#allocation5 + $0x680] sm:$0xff] }
  0x6e   :  { %1258 = vmatprep.mubr.f32.mxu1 %v1992_v52  ;;  %1223 = vmatmul.mubr.f32.gmra.mrb[2].mxu0 %v1992_v52  ;;  %v1566_v59 = vpack.c.bf16 %v119_v51, %v118_v50  ;;  %v208_v50 = vld [vmem:[#allocation5 + $0x530] sm:$0xff]  ;;  %v209_v51 = vld [vmem:[#allocation5 + $0x538] sm:$0xff] }
  0x6f   :  { %1259 = vmatmul.mubr.f32.gmra.mrb[2].mxu1 %v1992_v52  ;;  %1292 = vmatprep.mubr.f32.mxu0 %v1987_v45 }
  0x70   :  { %1328 = vmatprep.mubr.f32.mxu1 %v1987_v45 }
  0x73   :  { %1547 = vmatpush3.bf16.xpose.msra.mxu0 %v1546_v61  ;;  %v1568_v61 = vpack.c.bf16 %v137_v56, %v136_v55  ;;  %v226_v55 = vld [vmem:[#allocation5 + $0x5c0] sm:$0xff]  ;;  %v227_v56 = vld [vmem:[#allocation5 + $0x5c8] sm:$0xff] }
  0x74   :  { %1579 = vmatpush3.bf16.xpose.msra.mxu1 %v1578_v62  ;;  %1549 = vmatprep.subr.bf16.mxu0 %v1548_v63  ;;  %v1600_v62 = vpack.c.bf16 %v169_v58, %v168_v57  ;;  %v120_v63 = vld [vmem:[#allocation5 + $0x270] sm:$0xff]  ;;  %v1650_v58 = vpack.c.bf16 %v209_v51, %v208_v50  ;;  %v253_v51 = vld [vmem:[#allocation5 + $0x698] sm:$0xff] }
  0x75   :  { %1581 = vmatprep.subr.bf16.mxu1 %v1580_v0  ;;  %v121_v0 = vld [vmem:[#allocation5 + $0x278] sm:$0xff]  ;;  %v252_v50 = vld [vmem:[#allocation5 + $0x690] sm:$0xff] }
  0x76   :  { %v1570_v7 = vpack.c.bf16 %v121_v0, %v120_v63  ;;  %v210_v63 = vld [vmem:[#allocation5 + $0x540] sm:$0xff]  ;;  %v211_v0 = vld [vmem:[#allocation5 + $0x548] sm:$0xff] }
  0x7b   :  { %1551 = vmatpush3.bf16.xpose.msra.mxu0 %v1550_v9  ;;  %v1604_v9 = vpack.c.bf16 %v187_v4, %v186_v3  ;;  %v228_v3 = vld [vmem:[#allocation5 + $0x5d0] sm:$0xff]  ;;  %v229_v4 = vld [vmem:[#allocation5 + $0x5d8] sm:$0xff] }
  0x7c   :  { %1583 = vmatpush3.bf16.xpose.msra.mxu1 %v1582_v10  ;;  %1553 = vmatprep.subr.bf16.mxu0 %v1552_v11  ;;  %v1636_v10 = vpack.c.bf16 %v219_v6, %v218_v5  ;;  %v170_v11 = vld [vmem:[#allocation5 + $0x400] sm:$0xff]  ;;  %v1654_v6 = vpack.c.bf16 %v211_v0, %v210_v63  ;;  %v255_v0 = vld [vmem:[#allocation5 + $0x6a8] sm:$0xff] }
  0x7d   :  { %1585 = vmatprep.subr.bf16.mxu1 %v1584_v12  ;;  %v171_v12 = vld [vmem:[#allocation5 + $0x408] sm:$0xff]  ;;  %v254_v63 = vld [vmem:[#allocation5 + $0x6a0] sm:$0xff] }
  0x7e   :  { %v1606_v19 = vpack.c.bf16 %v171_v12, %v170_v11  ;;  %v212_v11 = vld [vmem:[#allocation5 + $0x550] sm:$0xff]  ;;  %v213_v12 = vld [vmem:[#allocation5 + $0x558] sm:$0xff] }
  0x83   :  { %1555 = vmatpush3.bf16.xpose.msra.mxu0 %v1554_v21  ;;  %v1608_v21 = vpack.c.bf16 %v189_v16, %v188_v15  ;;  %v230_v15 = vld [vmem:[#allocation5 + $0x5e0] sm:$0xff]  ;;  %v231_v16 = vld [vmem:[#allocation5 + $0x5e8] sm:$0xff] }
  0x84   :  { %1587 = vmatpush3.bf16.xpose.msra.mxu1 %v1586_v22  ;;  %1557 = vmatprep.subr.bf16.mxu0 %v1556_v23  ;;  %v1640_v22 = vpack.c.bf16 %v221_v18, %v220_v17  ;;  %v172_v23 = vld [vmem:[#allocation5 + $0x410] sm:$0xff]  ;;  %v1658_v18 = vpack.c.bf16 %v213_v12, %v212_v11  ;;  %v257_v12 = vld [vmem:[#allocation5 + $0x6b8] sm:$0xff] }
  0x85   :  { %1589 = vmatprep.subr.bf16.mxu1 %v1588_v24  ;;  %v173_v24 = vld [vmem:[#allocation5 + $0x418] sm:$0xff]  ;;  %v256_v11 = vld [vmem:[#allocation5 + $0x6b0] sm:$0xff] }
  0x86   :  { %v1610_v31 = vpack.c.bf16 %v173_v24, %v172_v23  ;;  %v214_v23 = vld [vmem:[#allocation5 + $0x560] sm:$0xff]  ;;  %v215_v24 = vld [vmem:[#allocation5 + $0x568] sm:$0xff] }
  0x8b   :  { %1559 = vmatpush3.bf16.xpose.msra.mxu0 %v1558_v33  ;;  %v1612_v33 = vpack.c.bf16 %v191_v28, %v190_v27  ;;  %v232_v27 = vld [vmem:[#allocation5 + $0x5f0] sm:$0xff]  ;;  %v233_v28 = vld [vmem:[#allocation5 + $0x5f8] sm:$0xff] }
  0x8c   :  { %1591 = vmatpush3.bf16.xpose.msra.mxu1 %v1590_v34  ;;  %1561 = vmatprep.subr.bf16.mxu0 %v1560_v35  ;;  %v1644_v34 = vpack.c.bf16 %v223_v30, %v222_v29  ;;  %v174_v35 = vld [vmem:[#allocation5 + $0x420] sm:$0xff]  ;;  %v1662_v30 = vpack.c.bf16 %v215_v24, %v214_v23  ;;  %v259_v24 = vld [vmem:[#allocation5 + $0x6c8] sm:$0xff] }
  0x8d   :  { %1593 = vmatprep.subr.bf16.mxu1 %v1592_v36  ;;  %v175_v36 = vld [vmem:[#allocation5 + $0x428] sm:$0xff]  ;;  %v258_v23 = vld [vmem:[#allocation5 + $0x6c0] sm:$0xff] }
  0x8e   :  { %v1614_v43 = vpack.c.bf16 %v175_v36, %v174_v35  ;;  %v216_v35 = vld [vmem:[#allocation5 + $0x570] sm:$0xff]  ;;  %v217_v36 = vld [vmem:[#allocation5 + $0x578] sm:$0xff] }
  0x93   :  { %1563 = vmatpush3.bf16.xpose.msra.mxu0 %v1562_v46  ;;  %v1616_v46 = vpack.c.bf16 %v193_v40, %v192_v39  ;;  %v282_v39 = vld [vmem:[#allocation5 + $0x780] sm:$0xff]  ;;  %v283_v40 = vld [vmem:[#allocation5 + $0x788] sm:$0xff] }
  0x94   :  { %1595 = vmatpush3.bf16.xpose.msra.mxu1 %v1594_v47  ;;  %1565 = vmatprep.subr.bf16.mxu0 %v1564_v48  ;;  %v1648_v47 = vpack.c.bf16 %v225_v42, %v224_v41  ;;  %v176_v48 = vld [vmem:[#allocation5 + $0x430] sm:$0xff]  ;;  %v1666_v42 = vpack.c.bf16 %v217_v36, %v216_v35  ;;  %v261_v36 = vld [vmem:[#allocation5 + $0x6d8] sm:$0xff] }
  0x95   :  { %1597 = vmatprep.subr.bf16.mxu1 %v1596_v49  ;;  %v177_v49 = vld [vmem:[#allocation5 + $0x438] sm:$0xff]  ;;  %v260_v35 = vld [vmem:[#allocation5 + $0x6d0] sm:$0xff] }
  0x96   :  { %v1618_v57 = vpack.c.bf16 %v177_v49, %v176_v48  ;;  %v266_v48 = vld [vmem:[#allocation5 + $0x700] sm:$0xff]  ;;  %v267_v49 = vld [vmem:[#allocation5 + $0x708] sm:$0xff] }
  0x9b   :  { %1567 = vmatpush3.bf16.xpose.msra.mxu0 %v1566_v59  ;;  %v1620_v59 = vpack.c.bf16 %v195_v54, %v194_v53  ;;  %v284_v53 = vld [vmem:[#allocation5 + $0x790] sm:$0xff]  ;;  %v285_v54 = vld [vmem:[#allocation5 + $0x798] sm:$0xff] }
  0x9c   :  { %1599 = vmatpush3.bf16.xpose.msra.mxu1 %v1598_v60  ;;  %1569 = vmatprep.subr.bf16.mxu0 %v1568_v61  ;;  %v1652_v60 = vpack.c.bf16 %v227_v56, %v226_v55  ;;  %v178_v61 = vld [vmem:[#allocation5 + $0x440] sm:$0xff]  ;;  %v1702_v56 = vpack.c.bf16 %v267_v49, %v266_v48  ;;  %v263_v49 = vld [vmem:[#allocation5 + $0x6e8] sm:$0xff] }
  0x9d   :  { %1601 = vmatprep.subr.bf16.mxu1 %v1600_v62  ;;  %v179_v62 = vld [vmem:[#allocation5 + $0x448] sm:$0xff]  ;;  %v262_v48 = vld [vmem:[#allocation5 + $0x6e0] sm:$0xff] }
  0x9e   :  { %v1622_v5 = vpack.c.bf16 %v179_v62, %v178_v61  ;;  %v268_v61 = vld [vmem:[#allocation5 + $0x710] sm:$0xff]  ;;  %v269_v62 = vld [vmem:[#allocation5 + $0x718] sm:$0xff] }
  0xa3   :  { %1571 = vmatpush3.bf16.xpose.msra.mxu0 %v1570_v7  ;;  %v1624_v7 = vpack.c.bf16 %v197_v2, %v196_v1  ;;  %v286_v1 = vld [vmem:[#allocation5 + $0x7a0] sm:$0xff]  ;;  %v287_v2 = vld [vmem:[#allocation5 + $0x7a8] sm:$0xff] }
  0xa4   :  { %1603 = vmatpush3.bf16.xpose.msra.mxu1 %v1602_v8  ;;  %1605 = vmatprep.subr.bf16.mxu0 %v1604_v9  ;;  %v1656_v8 = vpack.c.bf16 %v229_v4, %v228_v3  ;;  %v180_v9 = vld [vmem:[#allocation5 + $0x450] sm:$0xff]  ;;  %v1706_v4 = vpack.c.bf16 %v269_v62, %v268_v61  ;;  %v265_v62 = vld [vmem:[#allocation5 + $0x6f8] sm:$0xff] }
  0xa5   :  { %1637 = vmatprep.subr.bf16.mxu1 %v1636_v10  ;;  %v181_v10 = vld [vmem:[#allocation5 + $0x458] sm:$0xff]  ;;  %v264_v61 = vld [vmem:[#allocation5 + $0x6f0] sm:$0xff] }
  0xa6   :  { %v1626_v17 = vpack.c.bf16 %v181_v10, %v180_v9  ;;  %v270_v9 = vld [vmem:[#allocation5 + $0x720] sm:$0xff]  ;;  %v271_v10 = vld [vmem:[#allocation5 + $0x728] sm:$0xff] }
  0xaa   :  { %1293 = vmatmul.mubr.f32.vlgmr.msra.gmra.mrb[4].mxu0 %v1987_v45 }
  0xab   :  { %1329 = vmatmul.mubr.f32.vlgmr.msra.gmra.mrb[4].mxu1 %v1987_v45  ;;  %1607 = vmatpush3.bf16.xpose.msra.mxu0 %v1606_v19  ;;  %v1628_v19 = vpack.c.bf16 %v199_v14, %v198_v13  ;;  %v288_v13 = vld [vmem:[#allocation5 + $0x7b0] sm:$0xff]  ;;  %v289_v14 = vld [vmem:[#allocation5 + $0x7b8] sm:$0xff] }
  0xac   :  { %1639 = vmatpush3.bf16.xpose.msra.mxu1 %v1638_v20  ;;  %1609 = vmatprep.subr.bf16.mxu0 %v1608_v21  ;;  %v1660_v20 = vpack.c.bf16 %v231_v16, %v230_v15  ;;  %v182_v21 = vld [vmem:[#allocation5 + $0x460] sm:$0xff]  ;;  %v1710_v16 = vpack.c.bf16 %v271_v10, %v270_v9 }
  0xad   :  { %1641 = vmatprep.subr.bf16.mxu1 %v1640_v22  ;;  %1294 = vmatprep.mubr.f32.mxu0 %v1992_v52  ;;  %v183_v22 = vld [vmem:[#allocation5 + $0x468] sm:$0xff] }
  0xae   :  { %1330 = vmatprep.mubr.f32.mxu1 %v1992_v52  ;;  %1295 = vmatmul.mubr.f32.gmra.mrb[6].mxu0 %v1992_v52  ;;  %v1630_v29 = vpack.c.bf16 %v183_v22, %v182_v21  ;;  %v272_v21 = vld [vmem:[#allocation5 + $0x730] sm:$0xff]  ;;  %v273_v22 = vld [vmem:[#allocation5 + $0x738] sm:$0xff] }
  0xaf   :  { %1331 = vmatmul.mubr.f32.gmra.mrb[6].mxu1 %v1992_v52  ;;  %1364 = vmatprep.mubr.f32.mxu0 %v1987_v45 }
  0xb0   :  { %1400 = vmatprep.mubr.f32.mxu1 %v1987_v45 }
  0xb3   :  { %1611 = vmatpush3.bf16.xpose.msra.mxu0 %v1610_v31  ;;  %v1632_v31 = vpack.c.bf16 %v201_v26, %v200_v25  ;;  %v290_v25 = vld [vmem:[#allocation5 + $0x7c0] sm:$0xff]  ;;  %v291_v26 = vld [vmem:[#allocation5 + $0x7c8] sm:$0xff] }
  0xb4   :  { %1643 = vmatpush3.bf16.xpose.msra.mxu1 %v1642_v32  ;;  %1613 = vmatprep.subr.bf16.mxu0 %v1612_v33  ;;  %v1664_v32 = vpack.c.bf16 %v233_v28, %v232_v27  ;;  %v184_v33 = vld [vmem:[#allocation5 + $0x470] sm:$0xff]  ;;  %v1714_v28 = vpack.c.bf16 %v273_v22, %v272_v21 }
  0xb5   :  { %1645 = vmatprep.subr.bf16.mxu1 %v1644_v34  ;;  %v185_v34 = vld [vmem:[#allocation5 + $0x478] sm:$0xff] }
  0xb6   :  { %v1634_v41 = vpack.c.bf16 %v185_v34, %v184_v33  ;;  %v274_v33 = vld [vmem:[#allocation5 + $0x740] sm:$0xff]  ;;  %v275_v34 = vld [vmem:[#allocation5 + $0x748] sm:$0xff] }
  0xbb   :  { %1615 = vmatpush3.bf16.xpose.msra.mxu0 %v1614_v43  ;;  %v1668_v43 = vpack.c.bf16 %v251_v38, %v250_v37  ;;  %v292_v37 = vld [vmem:[#allocation5 + $0x7d0] sm:$0xff]  ;;  %v293_v38 = vld [vmem:[#allocation5 + $0x7d8] sm:$0xff] }
  0xbc   :  { %1647 = vmatpush3.bf16.xpose.msra.mxu1 %v1646_v44  ;;  %1617 = vmatprep.subr.bf16.mxu0 %v1616_v46  ;;  %v1700_v44 = vpack.c.bf16 %v283_v40, %v282_v39  ;;  %v234_v46 = vld [vmem:[#allocation5 + $0x600] sm:$0xff]  ;;  %v1718_v40 = vpack.c.bf16 %v275_v34, %v274_v33 }
  0xbd   :  { %1649 = vmatprep.subr.bf16.mxu1 %v1648_v47  ;;  %v235_v47 = vld [vmem:[#allocation5 + $0x608] sm:$0xff] }
  0xbe   :  { %v1670_v55 = vpack.c.bf16 %v235_v47, %v234_v46  ;;  %v276_v46 = vld [vmem:[#allocation5 + $0x750] sm:$0xff]  ;;  %v277_v47 = vld [vmem:[#allocation5 + $0x758] sm:$0xff] }
  0xc3   :  { %1619 = vmatpush3.bf16.xpose.msra.mxu0 %v1618_v57  ;;  %v1672_v57 = vpack.c.bf16 %v253_v51, %v252_v50  ;;  %v294_v50 = vld [vmem:[#allocation5 + $0x7e0] sm:$0xff]  ;;  %v295_v51 = vld [vmem:[#allocation5 + $0x7e8] sm:$0xff] }
  0xc4   :  { %1651 = vmatpush3.bf16.xpose.msra.mxu1 %v1650_v58  ;;  %1621 = vmatprep.subr.bf16.mxu0 %v1620_v59  ;;  %v1704_v58 = vpack.c.bf16 %v285_v54, %v284_v53  ;;  %v236_v59 = vld [vmem:[#allocation5 + $0x610] sm:$0xff]  ;;  %v1722_v54 = vpack.c.bf16 %v277_v47, %v276_v46 }
  0xc5   :  { %1653 = vmatprep.subr.bf16.mxu1 %v1652_v60  ;;  %v237_v60 = vld [vmem:[#allocation5 + $0x618] sm:$0xff] }
  0xc6   :  { %v1674_v3 = vpack.c.bf16 %v237_v60, %v236_v59  ;;  %v278_v59 = vld [vmem:[#allocation5 + $0x760] sm:$0xff]  ;;  %v279_v60 = vld [vmem:[#allocation5 + $0x768] sm:$0xff] }
  0xcb   :  { %1623 = vmatpush3.bf16.xpose.msra.mxu0 %v1622_v5  ;;  %v1676_v5 = vpack.c.bf16 %v255_v0, %v254_v63  ;;  %v296_v63 = vld [vmem:[#allocation5 + $0x7f0] sm:$0xff]  ;;  %v297_v0 = vld [vmem:[#allocation5 + $0x7f8] sm:$0xff] }
  0xcc   :  { %1655 = vmatpush3.bf16.xpose.msra.mxu1 %v1654_v6  ;;  %1625 = vmatprep.subr.bf16.mxu0 %v1624_v7  ;;  %v1708_v6 = vpack.c.bf16 %v287_v2, %v286_v1  ;;  %v238_v7 = vld [vmem:[#allocation5 + $0x620] sm:$0xff]  ;;  %v1726_v2 = vpack.c.bf16 %v279_v60, %v278_v59 }
  0xcd   :  { %1657 = vmatprep.subr.bf16.mxu1 %v1656_v8  ;;  %v239_v8 = vld [vmem:[#allocation5 + $0x628] sm:$0xff] }
  0xce   :  { %v1678_v15 = vpack.c.bf16 %v239_v8, %v238_v7  ;;  %v280_v7 = vld [vmem:[#allocation5 + $0x770] sm:$0xff]  ;;  %v281_v8 = vld [vmem:[#allocation5 + $0x778] sm:$0xff] }
  0xcf   :  { %v1730_v10 = vpack.c.bf16 %v281_v8, %v280_v7 }
  0xd3   :  { %1627 = vmatpush3.bf16.xpose.msra.mxu0 %v1626_v17  ;;  %v1680_v17 = vpack.c.bf16 %v257_v12, %v256_v11 }
  0xd4   :  { %1659 = vmatpush3.bf16.xpose.msra.mxu1 %v1658_v18  ;;  %1629 = vmatprep.subr.bf16.mxu0 %v1628_v19  ;;  %v1712_v18 = vpack.c.bf16 %v289_v14, %v288_v13  ;;  %v240_v19 = vld [vmem:[#allocation5 + $0x630] sm:$0xff] }
  0xd5   :  { %1661 = vmatprep.subr.bf16.mxu1 %v1660_v20  ;;  %v241_v20 = vld [vmem:[#allocation5 + $0x638] sm:$0xff] }
  0xd6   :  { %v1682_v27 = vpack.c.bf16 %v241_v20, %v240_v19 }
  0xdb   :  { %1631 = vmatpush3.bf16.xpose.msra.mxu0 %v1630_v29  ;;  %v1684_v29 = vpack.c.bf16 %v259_v24, %v258_v23 }
  0xdc   :  { %1663 = vmatpush3.bf16.xpose.msra.mxu1 %v1662_v30  ;;  %1633 = vmatprep.subr.bf16.mxu0 %v1632_v31  ;;  %v1716_v30 = vpack.c.bf16 %v291_v26, %v290_v25  ;;  %v242_v31 = vld [vmem:[#allocation5 + $0x640] sm:$0xff] }
  0xdd   :  { %1665 = vmatprep.subr.bf16.mxu1 %v1664_v32  ;;  %v243_v32 = vld [vmem:[#allocation5 + $0x648] sm:$0xff] }
  0xde   :  { %v1686_v39 = vpack.c.bf16 %v243_v32, %v242_v31 }
  0xe3   :  { %1635 = vmatpush3.bf16.xpose.msra.mxu0 %v1634_v41  ;;  %v1688_v41 = vpack.c.bf16 %v261_v36, %v260_v35 }
  0xe4   :  { %1667 = vmatpush3.bf16.xpose.msra.mxu1 %v1666_v42  ;;  %1669 = vmatprep.subr.bf16.mxu0 %v1668_v43  ;;  %v1720_v42 = vpack.c.bf16 %v293_v38, %v292_v37  ;;  %v244_v43 = vld [vmem:[#allocation5 + $0x650] sm:$0xff] }
  0xe5   :  { %1701 = vmatprep.subr.bf16.mxu1 %v1700_v44  ;;  %v245_v44 = vld [vmem:[#allocation5 + $0x658] sm:$0xff] }
  0xe6   :  { %v1690_v53 = vpack.c.bf16 %v245_v44, %v244_v43 }
  0xea   :  { %1365 = vmatmul.mubr.f32.vlgmr.msra.gmra.mrb[8].mxu0 %v1987_v45 }
  0xeb   :  { %1401 = vmatmul.mubr.f32.vlgmr.msra.gmra.mrb[8].mxu1 %v1987_v45  ;;  %1671 = vmatpush3.bf16.xpose.msra.mxu0 %v1670_v55  ;;  %v1692_v55 = vpack.c.bf16 %v263_v49, %v262_v48 }
  0xec   :  { %1703 = vmatpush3.bf16.xpose.msra.mxu1 %v1702_v56  ;;  %1673 = vmatprep.subr.bf16.mxu0 %v1672_v57  ;;  %v1724_v56 = vpack.c.bf16 %v295_v51, %v294_v50  ;;  %v246_v57 = vld [vmem:[#allocation5 + $0x660] sm:$0xff] }
  0xed   :  { %1705 = vmatprep.subr.bf16.mxu1 %v1704_v58  ;;  %1366 = vmatprep.mubr.f32.mxu0 %v1992_v52  ;;  %v247_v58 = vld [vmem:[#allocation5 + $0x668] sm:$0xff] }
  0xee   :  { %1402 = vmatprep.mubr.f32.mxu1 %v1992_v52  ;;  %1367 = vmatmul.mubr.f32.gmra.mrb[10].mxu0 %v1992_v52  ;;  %v1694_v1 = vpack.c.bf16 %v247_v58, %v246_v57 }
  0xef   :  { %1403 = vmatmul.mubr.f32.gmra.mrb[10].mxu1 %v1992_v52  ;;  %1436 = vmatprep.mubr.f32.mxu0 %v1987_v45 }
  0xf0   :  { %1472 = vmatprep.mubr.f32.mxu1 %v1987_v45 }
  0xf3   :  { %1675 = vmatpush3.bf16.xpose.msra.mxu0 %v1674_v3  ;;  %v1696_v3 = vpack.c.bf16 %v265_v62, %v264_v61 }
  0xf4   :  { %1707 = vmatpush3.bf16.xpose.msra.mxu1 %v1706_v4  ;;  %1677 = vmatprep.subr.bf16.mxu0 %v1676_v5  ;;  %v1728_v4 = vpack.c.bf16 %v297_v0, %v296_v63  ;;  %v248_v5 = vld [vmem:[#allocation5 + $0x670] sm:$0xff] }
  0xf5   :  { %1709 = vmatprep.subr.bf16.mxu1 %v1708_v6  ;;  %v249_v6 = vld [vmem:[#allocation5 + $0x678] sm:$0xff] }
  0xf6   :  { %v1698_v9 = vpack.c.bf16 %v249_v6, %v248_v5 }
  0xfb   :  { %1679 = vmatpush3.bf16.xpose.msra.mxu0 %v1678_v15 }
  0xfc   :  { %1711 = vmatpush3.bf16.xpose.msra.mxu1 %v1710_v16  ;;  %1681 = vmatprep.subr.bf16.mxu0 %v1680_v17 }
  0xfd   :  { %1713 = vmatprep.subr.bf16.mxu1 %v1712_v18 }
 0x103   :  { %1683 = vmatpush3.bf16.xpose.msra.mxu0 %v1682_v27 }
 0x104   :  { %1715 = vmatpush3.bf16.xpose.msra.mxu1 %v1714_v28  ;;  %1685 = vmatprep.subr.bf16.mxu0 %v1684_v29 }
 0x105   :  { %1717 = vmatprep.subr.bf16.mxu1 %v1716_v30 }
 0x10b   :  { %1687 = vmatpush3.bf16.xpose.msra.mxu0 %v1686_v39 }
 0x10c   :  { %1719 = vmatpush3.bf16.xpose.msra.mxu1 %v1718_v40  ;;  %1689 = vmatprep.subr.bf16.mxu0 %v1688_v41 }
 0x10d   :  { %1721 = vmatprep.subr.bf16.mxu1 %v1720_v42 }
 0x113   :  { %1691 = vmatpush3.bf16.xpose.msra.mxu0 %v1690_v53 }
 0x114   :  { %1723 = vmatpush3.bf16.xpose.msra.mxu1 %v1722_v54  ;;  %1693 = vmatprep.subr.bf16.mxu0 %v1692_v55 }
 0x115   :  { %1725 = vmatprep.subr.bf16.mxu1 %v1724_v56 }
 0x11b   :  { %1695 = vmatpush3.bf16.xpose.msra.mxu0 %v1694_v1 }
 0x11c   :  { %1727 = vmatpush3.bf16.xpose.msra.mxu1 %v1726_v2  ;;  %1697 = vmatprep.subr.bf16.mxu0 %v1696_v3 }
 0x11d   :  { %1729 = vmatprep.subr.bf16.mxu1 %v1728_v4 }
 0x123   :  { %1699 = vmatpush3.bf16.xpose.msra.mxu0 %v1698_v9 }
 0x124   :  { %1731 = vmatpush3.bf16.xpose.msra.mxu1 %v1730_v10 }
 0x12a   :  { %1437 = vmatmul.mubr.f32.vlgmr.msra.gmra.mrb[12].mxu0 %v1987_v45 }
 0x12b   :  { %1473 = vmatmul.mubr.f32.vlgmr.msra.gmra.mrb[12].mxu1 %v1987_v45  ;;  %1438 = vmatprep.mubr.f32.mxu0 %v1992_v52 }
 0x12c   :  { %1474 = vmatprep.mubr.f32.mxu1 %v1992_v52 }
 0x12e   :  { %1439 = vmatmul.mubr.f32.gmra.mrb[14].mxu0 %v1992_v52 }
 0x12f   :  { %1475 = vmatmul.mubr.f32.gmra.mrb[14].mxu1 %v1992_v52 }
 0x13d   :  { %v364_v11 = vpop.f32.mrb[0].mxu0 }
 0x13e   :  { %v1156_v12 = vmul.f32 -1.442695, %v364_v11  ;;  %v441_v13 = vpop.f32.mrb[0].mxu1  ;;  %v366_v14 = vpop.f32.mrb[1].mxu0 }
 0x13f   :  { %v1158_v15 = vmul.f32 -1.442695, %v441_v13  ;;  %v1157_v16 = vmul.f32 -1.442695, %v366_v14  ;;  %v443_v17 = vpop.f32.mrb[1].mxu1 }
 0x140   :  { %1738 = vpow2.f32 %v1156_v12  ;;  %v1159_v18 = vmul.f32 -1.442695, %v443_v17 }
 0x141   :  { %1740 = vpow2.f32 %v1158_v15  ;;  %v370_v19 = vpop.f32.mrb[2].mxu0 }
 0x142   :  { %1742 = vpow2.f32 %v1157_v16  ;;  %v1172_v45 = vmul.f32 -1.442695, %v370_v19  ;;  %v447_v20 = vpop.f32.mrb[2].mxu1  ;;  %v372_v21 = vpop.f32.mrb[3].mxu0 }
 0x143   :  { %1744 = vpow2.f32 %v1159_v18  ;;  %v1174_v22 = vmul.f32 -1.442695, %v447_v20  ;;  %v1173_v23 = vmul.f32 -1.442695, %v372_v21  ;;  %v449_v24 = vpop.f32.mrb[3].mxu1 }
 0x144   :  { %1746 = vpow2.f32 %v1172_v45  ;;  %v1175_v52 = vmul.f32 -1.442695, %v449_v24 }
 0x145   :  { %1748 = vpow2.f32 %v1174_v22 }
 0x146   :  { %1750 = vpow2.f32 %v1173_v23 }
 0x147   :  { %1752 = vpow2.f32 %v1175_v52 }
 0x14a   :  { %v1739_v25 = vpop.eup %1738 }
 0x14b   :  { %v1741_v26 = vpop.eup %1740  ;;  %v1010_v27 = vadd.f32 1.0, %v1739_v25 }
 0x14c   :  { %v1743_v28 = vpop.eup %1742  ;;  %v1012_v29 = vadd.f32 1.0, %v1741_v26 }
 0x14d   :  { %v1745_v30 = vpop.eup %1744  ;;  %1754 = vrcp.f32 %v1010_v27  ;;  %v1011_v31 = vadd.f32 1.0, %v1743_v28 }
 0x14e   :  { %v1747_v32 = vpop.eup %1746  ;;  %1756 = vrcp.f32 %v1012_v29  ;;  %v1013_v33 = vadd.f32 1.0, %v1745_v30 }
 0x14f   :  { %v1749_v34 = vpop.eup %1748  ;;  %1758 = vrcp.f32 %v1011_v31  ;;  %v1026_v35 = vadd.f32 1.0, %v1747_v32 }
 0x150   :  { %v1751_v36 = vpop.eup %1750  ;;  %1760 = vrcp.f32 %v1013_v33  ;;  %v1028_v37 = vadd.f32 1.0, %v1749_v34 }
 0x151   :  { %v1753_v38 = vpop.eup %1752  ;;  %1762 = vrcp.f32 %v1026_v35  ;;  %v1027_v39 = vadd.f32 1.0, %v1751_v36 }
 0x152   :  { %1764 = vrcp.f32 %v1028_v37  ;;  %v1029_v40 = vadd.f32 1.0, %v1753_v38 }
 0x153   :  { %1766 = vrcp.f32 %v1027_v39 }
 0x154   :  { %1768 = vrcp.f32 %v1029_v40 }
 0x157   :  { %v1755_v41 = vpop.eup %1754 }
 0x158   :  { %v1757_v42 = vpop.eup %1756  ;;  %1106 = vst [vmem:[#allocation7] sm:$0xff] %v1755_v41 }
 0x159   :  { %v1759_v43 = vpop.eup %1758  ;;  %1108 = vst [vmem:[#allocation7 + $0x10] sm:$0xff] %v1757_v42 }
 0x15a   :  { %v1761_v44 = vpop.eup %1760  ;;  %1107 = vst [vmem:[#allocation7 + $0x8] sm:$0xff] %v1759_v43 }
 0x15b   :  { %v1763_v46 = vpop.eup %1762  ;;  %1109 = vst [vmem:[#allocation7 + $0x18] sm:$0xff] %v1761_v44 }
 0x15c   :  { %v1765_v47 = vpop.eup %1764  ;;  %1122 = vst [vmem:[#allocation7 + $0x80] sm:$0xff] %v1763_v46 }
 0x15d   :  { %v1767_v48 = vpop.eup %1766  ;;  %1124 = vst [vmem:[#allocation7 + $0x90] sm:$0xff] %v1765_v47 }
 0x15e   :  { %v1769_v49 = vpop.eup %1768  ;;  %1123 = vst [vmem:[#allocation7 + $0x88] sm:$0xff] %v1767_v48 }
 0x15f   :  { %1125 = vst [vmem:[#allocation7 + $0x98] sm:$0xff] %v1769_v49 }
 0x17d   :  { %v518_v50 = vpop.f32.mrb[4].mxu0 }
 0x17e   :  { %v1160_v51 = vmul.f32 -1.442695, %v518_v50  ;;  %v595_v53 = vpop.f32.mrb[4].mxu1  ;;  %v520_v54 = vpop.f32.mrb[5].mxu0 }
 0x17f   :  { %v1162_v55 = vmul.f32 -1.442695, %v595_v53  ;;  %v1161_v56 = vmul.f32 -1.442695, %v520_v54  ;;  %v597_v57 = vpop.f32.mrb[5].mxu1 }
 0x180   :  { %1770 = vpow2.f32 %v1160_v51  ;;  %v1163_v58 = vmul.f32 -1.442695, %v597_v57 }
 0x181   :  { %1772 = vpow2.f32 %v1162_v55  ;;  %v524_v59 = vpop.f32.mrb[6].mxu0 }
 0x182   :  { %1774 = vpow2.f32 %v1161_v56  ;;  %v1176_v60 = vmul.f32 -1.442695, %v524_v59  ;;  %v601_v61 = vpop.f32.mrb[6].mxu1  ;;  %v526_v62 = vpop.f32.mrb[7].mxu0 }
 0x183   :  { %1776 = vpow2.f32 %v1163_v58  ;;  %v1178_v63 = vmul.f32 -1.442695, %v601_v61  ;;  %v1177_v0 = vmul.f32 -1.442695, %v526_v62  ;;  %v603_v1 = vpop.f32.mrb[7].mxu1 }
 0x184   :  { %1778 = vpow2.f32 %v1176_v60  ;;  %v1179_v2 = vmul.f32 -1.442695, %v603_v1 }
 0x185   :  { %1780 = vpow2.f32 %v1178_v63 }
 0x186   :  { %1782 = vpow2.f32 %v1177_v0 }
 0x187   :  { %1784 = vpow2.f32 %v1179_v2 }
 0x18a   :  { %v1771_v3 = vpop.eup %1770 }
 0x18b   :  { %v1773_v4 = vpop.eup %1772  ;;  %v1014_v5 = vadd.f32 1.0, %v1771_v3 }
 0x18c   :  { %v1775_v6 = vpop.eup %1774  ;;  %v1016_v7 = vadd.f32 1.0, %v1773_v4 }
 0x18d   :  { %v1777_v8 = vpop.eup %1776  ;;  %1786 = vrcp.f32 %v1014_v5  ;;  %v1015_v9 = vadd.f32 1.0, %v1775_v6 }
 0x18e   :  { %v1779_v10 = vpop.eup %1778  ;;  %1788 = vrcp.f32 %v1016_v7  ;;  %v1017_v11 = vadd.f32 1.0, %v1777_v8 }
 0x18f   :  { %v1781_v12 = vpop.eup %1780  ;;  %1790 = vrcp.f32 %v1015_v9  ;;  %v1030_v13 = vadd.f32 1.0, %v1779_v10 }
 0x190   :  { %v1783_v14 = vpop.eup %1782  ;;  %1792 = vrcp.f32 %v1017_v11  ;;  %v1032_v15 = vadd.f32 1.0, %v1781_v12 }
 0x191   :  { %v1785_v16 = vpop.eup %1784  ;;  %1794 = vrcp.f32 %v1030_v13  ;;  %v1031_v17 = vadd.f32 1.0, %v1783_v14 }
 0x192   :  { %1796 = vrcp.f32 %v1032_v15  ;;  %v1033_v18 = vadd.f32 1.0, %v1785_v16 }
 0x193   :  { %1798 = vrcp.f32 %v1031_v17 }
 0x194   :  { %1800 = vrcp.f32 %v1033_v18 }
 0x197   :  { %v1787_v19 = vpop.eup %1786 }
 0x198   :  { %v1789_v45 = vpop.eup %1788  ;;  %1110 = vst [vmem:[#allocation7 + $0x20] sm:$0xff] %v1787_v19 }
 0x199   :  { %v1791_v20 = vpop.eup %1790  ;;  %1112 = vst [vmem:[#allocation7 + $0x30] sm:$0xff] %v1789_v45 }
 0x19a   :  { %v1793_v21 = vpop.eup %1792  ;;  %1111 = vst [vmem:[#allocation7 + $0x28] sm:$0xff] %v1791_v20 }
 0x19b   :  { %v1795_v22 = vpop.eup %1794  ;;  %1113 = vst [vmem:[#allocation7 + $0x38] sm:$0xff] %v1793_v21 }
 0x19c   :  { %v1797_v23 = vpop.eup %1796  ;;  %1126 = vst [vmem:[#allocation7 + $0xa0] sm:$0xff] %v1795_v22 }
 0x19d   :  { %v1799_v24 = vpop.eup %1798  ;;  %1128 = vst [vmem:[#allocation7 + $0xb0] sm:$0xff] %v1797_v23 }
 0x19e   :  { %v1801_v52 = vpop.eup %1800  ;;  %1127 = vst [vmem:[#allocation7 + $0xa8] sm:$0xff] %v1799_v24 }
 0x19f   :  { %1129 = vst [vmem:[#allocation7 + $0xb8] sm:$0xff] %v1801_v52 }
 0x1bd   :  { %v672_v25 = vpop.f32.mrb[8].mxu0 }
 0x1be   :  { %v1164_v26 = vmul.f32 -1.442695, %v672_v25  ;;  %v749_v27 = vpop.f32.mrb[8].mxu1  ;;  %v674_v28 = vpop.f32.mrb[9].mxu0 }
 0x1bf   :  { %v1166_v29 = vmul.f32 -1.442695, %v749_v27  ;;  %v1165_v30 = vmul.f32 -1.442695, %v674_v28  ;;  %v751_v31 = vpop.f32.mrb[9].mxu1 }
 0x1c0   :  { %1802 = vpow2.f32 %v1164_v26  ;;  %v1167_v32 = vmul.f32 -1.442695, %v751_v31 }
 0x1c1   :  { %1804 = vpow2.f32 %v1166_v29  ;;  %v678_v33 = vpop.f32.mrb[10].mxu0 }
 0x1c2   :  { %1806 = vpow2.f32 %v1165_v30  ;;  %v1180_v34 = vmul.f32 -1.442695, %v678_v33  ;;  %v755_v35 = vpop.f32.mrb[10].mxu1  ;;  %v680_v36 = vpop.f32.mrb[11].mxu0 }
 0x1c3   :  { %1808 = vpow2.f32 %v1167_v32  ;;  %v1182_v37 = vmul.f32 -1.442695, %v755_v35  ;;  %v1181_v38 = vmul.f32 -1.442695, %v680_v36  ;;  %v757_v39 = vpop.f32.mrb[11].mxu1 }
 0x1c4   :  { %1810 = vpow2.f32 %v1180_v34  ;;  %v1183_v40 = vmul.f32 -1.442695, %v757_v39 }
 0x1c5   :  { %1812 = vpow2.f32 %v1182_v37 }
 0x1c6   :  { %1814 = vpow2.f32 %v1181_v38 }
 0x1c7   :  { %1816 = vpow2.f32 %v1183_v40 }
 0x1ca   :  { %v1803_v41 = vpop.eup %1802 }
 0x1cb   :  { %v1805_v42 = vpop.eup %1804  ;;  %v1018_v43 = vadd.f32 1.0, %v1803_v41 }
 0x1cc   :  { %v1807_v44 = vpop.eup %1806  ;;  %v1020_v46 = vadd.f32 1.0, %v1805_v42 }
 0x1cd   :  { %v1809_v47 = vpop.eup %1808  ;;  %1818 = vrcp.f32 %v1018_v43  ;;  %v1019_v48 = vadd.f32 1.0, %v1807_v44 }
 0x1ce   :  { %v1811_v49 = vpop.eup %1810  ;;  %1820 = vrcp.f32 %v1020_v46  ;;  %v1021_v50 = vadd.f32 1.0, %v1809_v47 }
 0x1cf   :  { %v1813_v51 = vpop.eup %1812  ;;  %1822 = vrcp.f32 %v1019_v48  ;;  %v1034_v53 = vadd.f32 1.0, %v1811_v49 }
 0x1d0   :  { %v1815_v54 = vpop.eup %1814  ;;  %1824 = vrcp.f32 %v1021_v50  ;;  %v1036_v55 = vadd.f32 1.0, %v1813_v51 }
 0x1d1   :  { %v1817_v56 = vpop.eup %1816  ;;  %1826 = vrcp.f32 %v1034_v53  ;;  %v1035_v57 = vadd.f32 1.0, %v1815_v54 }
 0x1d2   :  { %1828 = vrcp.f32 %v1036_v55  ;;  %v1037_v58 = vadd.f32 1.0, %v1817_v56 }
 0x1d3   :  { %1830 = vrcp.f32 %v1035_v57 }
 0x1d4   :  { %1832 = vrcp.f32 %v1037_v58 }
 0x1d7   :  { %v1819_v59 = vpop.eup %1818 }
 0x1d8   :  { %v1821_v60 = vpop.eup %1820  ;;  %1114 = vst [vmem:[#allocation7 + $0x40] sm:$0xff] %v1819_v59 }
 0x1d9   :  { %v1823_v61 = vpop.eup %1822  ;;  %1116 = vst [vmem:[#allocation7 + $0x50] sm:$0xff] %v1821_v60 }
 0x1da   :  { %v1825_v62 = vpop.eup %1824  ;;  %1115 = vst [vmem:[#allocation7 + $0x48] sm:$0xff] %v1823_v61 }
 0x1db   :  { %v1827_v63 = vpop.eup %1826  ;;  %1117 = vst [vmem:[#allocation7 + $0x58] sm:$0xff] %v1825_v62 }
 0x1dc   :  { %v1829_v0 = vpop.eup %1828  ;;  %1130 = vst [vmem:[#allocation7 + $0xc0] sm:$0xff] %v1827_v63 }
 0x1dd   :  { %v1831_v1 = vpop.eup %1830  ;;  %1132 = vst [vmem:[#allocation7 + $0xd0] sm:$0xff] %v1829_v0 }
 0x1de   :  { %v1833_v2 = vpop.eup %1832  ;;  %1131 = vst [vmem:[#allocation7 + $0xc8] sm:$0xff] %v1831_v1 }
 0x1df   :  { %1133 = vst [vmem:[#allocation7 + $0xd8] sm:$0xff] %v1833_v2 }
 0x1fd   :  { %v826_v3 = vpop.f32.mrb[12].mxu0 }
 0x1fe   :  { %v1168_v4 = vmul.f32 -1.442695, %v826_v3  ;;  %v903_v5 = vpop.f32.mrb[12].mxu1  ;;  %v828_v6 = vpop.f32.mrb[13].mxu0 }
 0x1ff   :  { %v1170_v7 = vmul.f32 -1.442695, %v903_v5  ;;  %v1169_v8 = vmul.f32 -1.442695, %v828_v6  ;;  %v905_v9 = vpop.f32.mrb[13].mxu1 }
 0x200   :  { %1834 = vpow2.f32 %v1168_v4  ;;  %v1171_v10 = vmul.f32 -1.442695, %v905_v9 }
 0x201   :  { %1836 = vpow2.f32 %v1170_v7  ;;  %v832_v11 = vpop.f32.mrb[14].mxu0 }
 0x202   :  { %1838 = vpow2.f32 %v1169_v8  ;;  %v1184_v12 = vmul.f32 -1.442695, %v832_v11  ;;  %v909_v13 = vpop.f32.mrb[14].mxu1  ;;  %v834_v14 = vpop.f32.mrb[15].mxu0 }
 0x203   :  { %1840 = vpow2.f32 %v1171_v10  ;;  %v1186_v15 = vmul.f32 -1.442695, %v909_v13  ;;  %v1185_v16 = vmul.f32 -1.442695, %v834_v14  ;;  %v911_v17 = vpop.f32.mrb[15].mxu1 }
 0x204   :  { %1842 = vpow2.f32 %v1184_v12  ;;  %v1187_v18 = vmul.f32 -1.442695, %v911_v17 }
 0x205   :  { %1844 = vpow2.f32 %v1186_v15 }
 0x206   :  { %1846 = vpow2.f32 %v1185_v16 }
 0x207   :  { %1848 = vpow2.f32 %v1187_v18 }
 0x20a   :  { %v1835_v19 = vpop.eup %1834 }
 0x20b   :  { %v1837_v45 = vpop.eup %1836  ;;  %v1022_v20 = vadd.f32 1.0, %v1835_v19 }
 0x20c   :  { %v1839_v21 = vpop.eup %1838  ;;  %v1024_v22 = vadd.f32 1.0, %v1837_v45 }
 0x20d   :  { %v1841_v23 = vpop.eup %1840  ;;  %1850 = vrcp.f32 %v1022_v20  ;;  %v1023_v24 = vadd.f32 1.0, %v1839_v21 }
 0x20e   :  { %v1843_v52 = vpop.eup %1842  ;;  %1852 = vrcp.f32 %v1024_v22  ;;  %v1025_v25 = vadd.f32 1.0, %v1841_v23 }
 0x20f   :  { %v1845_v26 = vpop.eup %1844  ;;  %1854 = vrcp.f32 %v1023_v24  ;;  %v1038_v27 = vadd.f32 1.0, %v1843_v52 }
 0x210   :  { %v1847_v28 = vpop.eup %1846  ;;  %1856 = vrcp.f32 %v1025_v25  ;;  %v1040_v29 = vadd.f32 1.0, %v1845_v26 }
 0x211   :  { %v1849_v30 = vpop.eup %1848  ;;  %1858 = vrcp.f32 %v1038_v27  ;;  %v1039_v31 = vadd.f32 1.0, %v1847_v28 }
 0x212   :  { %1860 = vrcp.f32 %v1040_v29  ;;  %v1041_v32 = vadd.f32 1.0, %v1849_v30 }
 0x213   :  { %1862 = vrcp.f32 %v1039_v31 }
 0x214   :  { %1864 = vrcp.f32 %v1041_v32 }
 0x217   :  { %v1851_v33 = vpop.eup %1850 }
 0x218   :  { %v1853_v34 = vpop.eup %1852  ;;  %1118 = vst [vmem:[#allocation7 + $0x60] sm:$0xff] %v1851_v33 }
 0x219   :  { %v1855_v35 = vpop.eup %1854  ;;  %1120 = vst [vmem:[#allocation7 + $0x70] sm:$0xff] %v1853_v34 }
 0x21a   :  { %v1857_v36 = vpop.eup %1856  ;;  %1119 = vst [vmem:[#allocation7 + $0x68] sm:$0xff] %v1855_v35 }
 0x21b   :  { %v1859_v37 = vpop.eup %1858  ;;  %1121 = vst [vmem:[#allocation7 + $0x78] sm:$0xff] %v1857_v36 }
 0x21c   :  { %v1861_v38 = vpop.eup %1860  ;;  %1134 = vst [vmem:[#allocation7 + $0xe0] sm:$0xff] %v1859_v37 }
 0x21d   :  { %v1863_v39 = vpop.eup %1862  ;;  %1136 = vst [vmem:[#allocation7 + $0xf0] sm:$0xff] %v1861_v38 }
 0x21e   :  { %v1865_v40 = vpop.eup %1864  ;;  %1135 = vst [vmem:[#allocation7 + $0xe8] sm:$0xff] %v1863_v39 }
 0x21f   :  { %1137 = vst [vmem:[#allocation7 + $0xf8] sm:$0xff] %v1865_v40 }
 0x220   :  { %1921 = shalt.err (!%p1918_p6)
}
 0x221   :  { %s1922_s10 = scalar_lea.hbm %s2038_s2, 4096 }
 0x222   :  { %p1923_p7 = scmp.ne.s32.totalorder %s2038_s2, %s1922_s10  ;;  %p1926_p8 = scmp.lt.u32.totalorder %s1922_s10, %s2038_s2 }
 0x224   :  { %p1928_p9 = pnand %p1926_p8, %p1923_p7 }
 0x226   :  { %1931 = shalt.err (!%p1928_p9)
}
 0x227   :  { %s1943_s15 = smov 2048  }
 0x228   :  { %1149 = dma.vmem_to_hbm [thread:$0]  %s1144_s6, 4096, %s2038_s2, [#allocation4], %s1943_s15, %s1943_s15, %s1939_s19  }
 0x229   :  { %1936 = dma.done.wait [#allocation4], 4096  }
 0x22a   :  { %1937 = vsyncadd [#allocation4], 4294963200 }
 0x22b   :  { %1153 = vsyncpa [#allocation3], 1 }
 0x22c   :  { %1154 = vsyncpa [#allocation6], 1 }
 0x22d   :  { %1155 = vsyncpa [#allocation4], 1 }

</bundles_post_ra>
